<compile_context>
chip_gen: v5e
topology: v5e:2x2
jax: 0.10.0
libtpu: 0.0.40
codegen_flags: <defaults>
</compile_context>

<pallas_src>
from functools import partial

import jax
import jax.numpy as jnp
from jax.experimental import pallas as pl
from jax.experimental.pallas import tpu as pltpu


# ----------------------------------------------------------------------------
# Pallas kernels
# ----------------------------------------------------------------------------
def _conv1x1_kernel(x_ref, w_ref, b_ref, o_ref):
    # 1x1 Conv1d over channels, channels-on-sublanes: out = W @ x + b_col.
    # bf16 operands -> bf16 MXU path, f32 accumulation.
    acc = jnp.dot(w_ref[...], x_ref[...], preferred_element_type=jnp.float32)
    o_ref[...] = (acc + b_ref[...]).astype(o_ref.dtype)


def _spectral_kernel(lam, c, xr_ref, xi_ref, w1a_ref, w1b_ref, w2_ref,
                     b1_ref, b2_ref, or_ref, oi_ref):
    """Packed complex block-diagonal 2-layer MLP, layer 2 pre-folded.

    xr_ref, xi_ref : (C, tn) bf16 real / imag slabs (transposed).
    w1a_ref        : (2C, C) bf16  = [w1r^T ; w1i^T]
    w1b_ref        : (2C, C) bf16  = [-w1i^T ; w1r^T]
    w2_ref         : (2C, 2C) bf16 = [[w2r^T, -w2i^T],
                                      [w2i^T@w2r^T, w2r^T - w2i^T@w2i^T]]
    b1_ref, b2_ref : (2C, 1) f32 column biases (b2 pre-folded).
    or_ref, oi_ref : (C, tn) bf16 outputs (real / imag).

    The wrapper-side fold of layer 2 is algebraically identical to the
    PyTorch quirk (imag uses the *updated* real part) but removes the serial
    r2 -> i2 dependency and all in-kernel concatenates.
    """
    dot = lambda a, b: jnp.dot(a, b, preferred_element_type=jnp.float32)

    # layer 1: complex linear + ReLU as two half-K MXU dots (f32 accumulate).
    h1 = jnp.maximum(
        dot(w1a_ref[...], xr_ref[...]) + dot(w1b_ref[...], xi_ref[...])
        + b1_ref[...], 0.0)                                       # (2C, tn) f32

    # layer 2: one packed (2C,2C) x (2C,tn) dot; no serial dependency.
    o = dot(w2_ref[...], h1.astype(w2_ref.dtype)) + b2_ref[...]   # (2C, tn) f32

    if lam:  # softshrink (static config): x - clip(x, -lam, lam)
        o = o - jnp.clip(o, -lam, lam)

    o = o.astype(or_ref.dtype)
    or_ref[...] = o[:c, :]
    oi_ref[...] = o[c:, :]


# ----------------------------------------------------------------------------
# Tiling helpers
# ----------------------------------------------------------------------------
def _round_up(x, m):
    return (x + m - 1) // m * m


def _vmem_budget():
    """(per-kernel slab byte budget, vmem_limit_bytes) sized from the chip."""
    try:
        cap = int(pltpu.get_tpu_info().vmem_capacity_bytes)
    except Exception:  # pragma: no cover - defensive fallback
        cap = 64 * 1024 * 1024
    vmem_limit = min(cap - (16 << 20), 96 << 20)   # headroom below physical
    return vmem_limit // 2, vmem_limit


def _lane_tile(n, bytes_per_lane, fixed_bytes, budget, max_tn=8192):
    """Pad the lane axis to a multiple of 128 and pick a VMEM-sized tile."""
    n_pad = _round_up(n, 128)
    avail = max(budget - fixed_bytes, 128 * bytes_per_lane)
    tn_cap = max(128, min(max_tn, avail // bytes_per_lane // 128 * 128))
    if n_pad <= tn_cap:
        # Split into >= 2 lane tiles when possible so both v7x TensorCores
        # get work under dimension_semantics=("parallel",).
        if n_pad >= 256:
            tn = _round_up((n_pad + 1) // 2, 128)
            return _round_up(n_pad, tn), tn
        return n_pad, n_pad
    return _round_up(n, tn_cap), tn_cap


# ----------------------------------------------------------------------------
# Pallas wrappers
# ----------------------------------------------------------------------------
def conv1x1_pallas(xT, w, b_col):
    """xT: (C_in, T) bf16, w: (C_out, C_in) bf16, b_col: (C_out, 1) f32."""
    c_out, c_in = w.shape
    _, t = xT.shape
    # per-lane bytes: bf16 in (x2 buf) + bf16 out (x2 buf) + f32 accumulator
    bytes_per_lane = 4 * c_in + 4 * c_out + 4 * c_out
    fixed = 2 * (c_out * c_in * 2) + c_out * 4
    budget, vmem_limit = _vmem_budget()
    tp, tn = _lane_tile(t, bytes_per_lane, fixed, budget)

    # TODO(synk): handle the ragged last tile with an in-kernel masked store
    # instead of a host-side pad copy when (tp - t) is a large fraction of T.
    xp = jnp.pad(xT, ((0, 0), (0, tp - t))) if tp != t else xT

    out = pl.pallas_call(
        _conv1x1_kernel,
        out_shape=jax.ShapeDtypeStruct((c_out, tp), jnp.bfloat16),
        grid=(tp // tn,),
        in_specs=[
            pl.BlockSpec((c_in, tn), lambda j: (0, j)),
            pl.BlockSpec((c_out, c_in), lambda j: (0, 0)),
            pl.BlockSpec((c_out, 1), lambda j: (0, 0)),
        ],
        out_specs=pl.BlockSpec((c_out, tn), lambda j: (0, j)),
        compiler_params=pltpu.CompilerParams(
            dimension_semantics=("parallel",),
            vmem_limit_bytes=vmem_limit),
    )(xp, w, b_col)
    return out[:, :t] if tp != t else out


def spectral_mlp_pallas(xrT, xiT, w1a, w1b, w2f, b1c, b2c, lam):
    """xrT/xiT: (C, M) bf16; packed bf16 weights; -> (o_rT, o_iT) (C, M) bf16."""
    c, m = xrT.shape
    c2 = 2 * c
    # per-lane bytes: 2 bf16 in-slabs + 2 bf16 out-slabs (double-buffered)
    # + (2C) f32 h1/o temps + a bf16 copy of h1.
    bytes_per_lane = 2 * (2 * c * 2) * 2 + 2 * (c2 * 4) + c2 * 2
    fixed = 2 * (2 * c2 * c * 2 + c2 * c2 * 2) + 2 * c2 * 4
    budget, vmem_limit = _vmem_budget()
    mp, tn = _lane_tile(m, bytes_per_lane, fixed, budget)

    pad = mp - m
    if pad:
        # TODO(synk): masked last-tile store instead of host pad when pad/M is large.
        xrT = jnp.pad(xrT, ((0, 0), (0, pad)))
        xiT = jnp.pad(xiT, ((0, 0), (0, pad)))

    kern = partial(_spectral_kernel, float(lam) if lam else 0.0, c)
    o_r, o_i = pl.pallas_call(
        kern,
        out_shape=(jax.ShapeDtypeStruct((c, mp), jnp.bfloat16),
                   jax.ShapeDtypeStruct((c, mp), jnp.bfloat16)),
        grid=(mp // tn,),
        in_specs=[
            pl.BlockSpec((c, tn), lambda j: (0, j)),      # xrT
            pl.BlockSpec((c, tn), lambda j: (0, j)),      # xiT
            pl.BlockSpec((c2, c), lambda j: (0, 0)),      # w1a
            pl.BlockSpec((c2, c), lambda j: (0, 0)),      # w1b
            pl.BlockSpec((c2, c2), lambda j: (0, 0)),     # w2 (folded)
            pl.BlockSpec((c2, 1), lambda j: (0, 0)),      # b1
            pl.BlockSpec((c2, 1), lambda j: (0, 0)),      # b2 (folded)
        ],
        out_specs=(pl.BlockSpec((c, tn), lambda j: (0, j)),
                   pl.BlockSpec((c, tn), lambda j: (0, j))),
        compiler_params=pltpu.CompilerParams(
            dimension_semantics=("parallel",),
            vmem_limit_bytes=vmem_limit),
    )(xrT, xiT, w1a, w1b, w2f, b1c, b2c)
    if pad:
        o_r, o_i = o_r[:, :m], o_i[:, :m]
    return o_r, o_i


# ----------------------------------------------------------------------------
# Full forward (glue: reshapes, FFT, weight packing & layer-2 fold)
# ----------------------------------------------------------------------------
def _block_diag(wb):
    # wb: (num_blocks, bs, bs) -> dense (C, C) block-diagonal matrix, matching
    # einsum '...bd,bdk->...bk'.
    # TODO(synk): for large C keep the block-diagonal structure (batched bs x bs
    # matmuls) instead of a dense (C, C) embedding — densifying inflates MXU
    # FLOPs by num_blocks x once the spectral dots become compute-bound.
    return jax.scipy.linalg.block_diag(*[wb[k] for k in range(wb.shape[0])])


def afno_forward(x, params, h, w, num_blocks, softshrink, use_bias):
    B, N, C = x.shape
    assert N == h * w and C % num_blocks == 0

    # --- bias path (1x1 Conv1d over channels), channels-on-sublanes, bf16 ---
    if use_bias:
        xT = x.reshape(B * N, C).T.astype(jnp.bfloat16)          # (C, B*N)
        wc = params["conv_w"].astype(jnp.bfloat16)
        bc = params["conv_b"].astype(jnp.float32).reshape(C, 1)
        bias = conv1x1_pallas(xT, wc, bc)                        # (C, B*N) bf16
        bias = bias.T.reshape(B, N, C).astype(jnp.float32)
    else:
        bias = jnp.zeros_like(x)

    # --- spectral path ---
    # TODO(synk): rfft2/irfft2 have no Pallas TPU primitive; stays in plain JAX.
    xs = x.reshape(B, h, w, C)
    xf = jnp.fft.rfft2(xs, axes=(1, 2), norm="ortho")            # (B,h,wf,C) c64
    wf = xf.shape[2]
    M = B * h * wf
    # split real/imag inputs (no concat pass); casts fuse with the transpose.
    xrT = jnp.real(xf).reshape(M, C).T.astype(jnp.bfloat16)      # (C, M)
    xiT = jnp.imag(xf).reshape(M, C).T.astype(jnp.bfloat16)      # (C, M)

    w1, b1, w2, b2 = params["w1"], params["b1"], params["w2"], params["b2"]
    w1rT, w1iT = _block_diag(w1[0]).T, _block_diag(w1[1]).T
    w2rT, w2iT = _block_diag(w2[0]).T, _block_diag(w2[1]).T
    b1r, b1i = b1[0].reshape(-1), b1[1].reshape(-1)
    b2r, b2i = b2[0].reshape(-1), b2[1].reshape(-1)

    # Layer-1 packed weights (column convention y^T = W^T @ x^T), split per
    # real/imag input so the kernel needs no input concat.
    w1a = jnp.concatenate([w1rT, w1iT], axis=0)                  # (2C, C)
    w1b = jnp.concatenate([-w1iT, w1rT], axis=0)                 # (2C, C)

    # Layer-2 algebraic fold (exactly equivalent to the PyTorch quirk where
    # imag uses the updated real part):
    #   r2 = w2r^T r1 - w2i^T i1 + b2r
    #   i2 = (w2i^T w2r^T) r1 + (w2r^T - w2i^T w2i^T) i1 + (w2i^T b2r + b2i)
    w2f = jnp.block([[w2rT, -w2iT],
                     [w2iT @ w2rT, w2rT - w2iT @ w2iT]])         # (2C, 2C)
    b1c = jnp.concatenate([b1r, b1i]).reshape(2 * C, 1).astype(jnp.float32)
    b2c = jnp.concatenate([b2r, w2iT @ b2r + b2i]).reshape(2 * C, 1)
    b2c = b2c.astype(jnp.float32)

    # bf16 MXU operands (fold computed in f32 above, then cast).
    w1a, w1b, w2f = (t.astype(jnp.bfloat16) for t in (w1a, w1b, w2f))

    o_rT, o_iT = spectral_mlp_pallas(xrT, xiT, w1a, w1b, w2f, b1c, b2c,
                                     softshrink)                 # (C, M) x2

    yf = (o_rT.T.astype(jnp.float32)
          + 1j * o_iT.T.astype(jnp.float32)).reshape(B, h, wf, C)
    y = jnp.fft.irfft2(yf, s=(h, w), axes=(1, 2), norm="ortho")
    return y.reshape(B, N, C).astype(jnp.float32) + bias


# ----------------------------------------------------------------------------
# Pure-JAX reference (mirrors the PyTorch code 1:1, f32)
# ----------------------------------------------------------------------------
def afno_reference(x, params, h, w, num_blocks, softshrink, use_bias):
    B, N, C = x.shape
    bs = C // num_blocks
    if use_bias:
        bias = jnp.einsum("bnc,oc->bno", x, params["conv_w"]) + params["conv_b"]
    else:
        bias = jnp.zeros_like(x)
    xf = jnp.fft.rfft2(x.reshape(B, h, w, C), axes=(1, 2), norm="ortho")
    xf = xf.reshape(B, h, xf.shape[2], num_blocks, bs)
    mult = lambda inp, wt: jnp.einsum("...bd,bdk->...bk", inp, wt)
    w1, b1, w2, b2 = params["w1"], params["b1"], params["w2"], params["b2"]
    xr, xi = jnp.real(xf), jnp.imag(xf)
    r1 = jax.nn.relu(mult(xr, w1[0]) - mult(xi, w1[1]) + b1[0])
    i1 = jax.nn.relu(mult(xr, w1[1]) + mult(xi, w1[0]) + b1[1])
    r2 = mult(r1, w2[0]) - mult(i1, w2[1]) + b2[0]
    i2 = mult(r2, w2[1]) + mult(i1, w2[0]) + b2[1]  # same quirk as PyTorch
    if softshrink:
        lam = softshrink
        ss = lambda v: jnp.where(v > lam, v - lam,
                                 jnp.where(v < -lam, v + lam, 0.0))
        r2, i2 = ss(r2), ss(i2)
    yf = (r2 + 1j * i2).reshape(B, h, -1, C)
    y = jnp.fft.irfft2(yf, s=(h, w), axes=(1, 2), norm="ortho")
    return y.reshape(B, N, C) + bias


# ----------------------------------------------------------------------------
if __name__ == "__main__":
    # module config
    dim = 32            # hidden_size C
    h, w = 8, 8         # spatial grid, N = h*w
    fno_blocks = 4      # num_blocks -> block_size = 8
    fno_bias = True
    fno_softshrink = 0.01
    B, N, C = 2, h * w, dim
    bs = dim // fno_blocks
    scale = 0.02

    key = jax.random.PRNGKey(0)
    ks = jax.random.split(key, 7)
    params = {
        "w1": scale * jax.random.normal(ks[0], (2, fno_blocks, bs, bs), jnp.float32),
        "b1": scale * jax.random.normal(ks[1], (2, fno_blocks, bs), jnp.float32),
        "w2": scale * jax.random.normal(ks[2], (2, fno_blocks, bs, bs), jnp.float32),
        "b2": scale * jax.random.normal(ks[3], (2, fno_blocks, bs), jnp.float32),
        # nn.Conv1d(C, C, 1): weight (C, C, 1) squeezed to (C_out, C_in), bias (C,)
        # TODO(synk): PyTorch Conv1d uses kaiming-uniform init; deterministic normal here.
        "conv_w": scale * jax.random.normal(ks[4], (C, C), jnp.float32),
        "conv_b": scale * jax.random.normal(ks[5], (C,), jnp.float32),
    }
    x = jax.random.normal(ks[6], (B, N, C), jnp.float32)

    out = afno_forward(x, params, h, w, fno_blocks, fno_softshrink, fno_bias)
    out = jax.block_until_ready(out)

    ref = afno_reference(x, params, h, w, fno_blocks, fno_softshrink, fno_bias)
    assert out.shape == (B, N, C)
    # Tolerance deliberately relaxed vs the f32-only version: MXU operands and
    # activation slabs are bf16 (per perf review), reference is f32.
    assert jnp.allclose(out, ref, atol=1e-2, rtol=1e-2), (
        float(jnp.max(jnp.abs(out - ref))))

    print("KERNEL_OK")
</pallas_src>

<mosaic_0001>
module attributes {stable_mosaic.version = 11 : i64} {
  func.func @_conv1x1_kernel(%arg0: i32, %arg1: memref<32x128xbf16, #tpu.memory_space<vmem>>, %arg2: memref<32x32xbf16, #tpu.memory_space<vmem>>, %arg3: memref<32x1xf32, #tpu.memory_space<vmem>>, %arg4: memref<32x128xbf16, #tpu.memory_space<vmem>>) attributes {dimension_semantics = [#tpu.dimension_semantics<parallel>], iteration_bounds = array<i64: 1>, scalar_prefetch = 0 : i64, scratch_operands = 0 : i64, tpu.core_type = #tpu.core_type<tc>, window_params = [{transform_indices = @transform_0, window_bounds = array<i64: 32, 128>}, {pipeline_mode = #tpu.pipeline_mode<synchronous>, transform_indices = @transform_1, window_bounds = array<i64: 32, 32>}, {pipeline_mode = #tpu.pipeline_mode<synchronous>, transform_indices = @transform_2, window_bounds = array<i64: 32, 1>}, {transform_indices = @transform_3, window_bounds = array<i64: 32, 128>}]} {
    %c0 = arith.constant 0 : index
    %c0_0 = arith.constant 0 : index
    %0 = vector.load %arg2[%c0, %c0_0] : memref<32x32xbf16, #tpu.memory_space<vmem>>, vector<32x32xbf16>
    %c0_1 = arith.constant 0 : index
    %c0_2 = arith.constant 0 : index
    %1 = vector.load %arg1[%c0_1, %c0_2] : memref<32x128xbf16, #tpu.memory_space<vmem>>, vector<32x128xbf16>
    %cst = arith.constant dense<0.000000e+00> : vector<32x128xf32>
    %2 = tpu.matmul %0, %1, %cst {dimension_numbers = #tpu.dot_dimension_numbers<[1], [0], [0], [1], [0, 0, 1, 1], [], []>} : vector<32x32xbf16>, vector<32x128xbf16>, vector<32x128xf32> -> vector<32x128xf32>
    %c0_3 = arith.constant 0 : index
    %c0_4 = arith.constant 0 : index
    %3 = vector.load %arg3[%c0_3, %c0_4] : memref<32x1xf32, #tpu.memory_space<vmem>>, vector<32x1xf32>
    %4 = vector.broadcast %3 : vector<32x1xf32> to vector<32x128xf32>
    %5 = arith.addf %2, %4 : vector<32x128xf32>
    %6 = arith.truncf %5 : vector<32x128xf32> to vector<32x128xbf16>
    %c0_5 = arith.constant 0 : index
    %c0_6 = arith.constant 0 : index
    %7 = vector.load %arg4[%c0_5, %c0_6] : memref<32x128xbf16, #tpu.memory_space<vmem>>, vector<32x128xbf16>
    tpu.vector_store %arg4[%c0_5, %c0_6], %6 {strides = array<i32>} : memref<32x128xbf16, #tpu.memory_space<vmem>>, vector<32x128xbf16>,
    return
  }
  func.func @transform_0(%arg0: i32) -> (i32, i32) {
    %c0_i32 = arith.constant 0 : i32
    %c0_i32_0 = arith.constant 0 : i32
    return %c0_i32, %arg0 : i32, i32
  }
  func.func @transform_1(%arg0: i32) -> (i32, i32) {
    %c0_i32 = arith.constant 0 : i32
    %c0_i32_0 = arith.constant 0 : i32
    %c0_i32_1 = arith.constant 0 : i32
    return %c0_i32, %c0_i32_0 : i32, i32
  }
  func.func @transform_2(%arg0: i32) -> (i32, i32) {
    %c0_i32 = arith.constant 0 : i32
    %c0_i32_0 = arith.constant 0 : i32
    %c0_i32_1 = arith.constant 0 : i32
    return %c0_i32, %c0_i32_0 : i32, i32
  }
  func.func @transform_3(%arg0: i32) -> (i32, i32) {
    %c0_i32 = arith.constant 0 : i32
    %c0_i32_0 = arith.constant 0 : i32
    return %c0_i32, %arg0 : i32, i32
  }
}

</mosaic_0001>

<bundles_post_ra>
// kernel: tpu_custom_call.1
= control target key start
LH: loop header
LB: loop body
LE: loop exit
PB: predicated region body
PF: predicated region fallthrough
CT: control target
= control target key end

     0   :  { %v189_v1 = vmov 0   ;;  %s240_s0 = inlined_call_operand.vmem [shape: bf16[32,128], index: 0, kind: input, shape index: {}]   ;;  %s241_s1 = inlined_call_operand.vmem [shape: bf16[32,32], index: 1, kind: input, shape index: {}]   ;;  %s242_s2 = inlined_call_operand.vmem [shape: f32[32,1], index: 2, kind: input, shape index: {}]   ;;  %s243_s3 = inlined_call_operand.hbm [shape: bf16[32,128], index: 3, kind: output, shape index: {}]  }
   0x1   :  { %v143_v0 = vld [vmem:[%s240_s0 + $0x8] sm:$0xff]  ;;  %162 = vset.pattern.permute.xlu1 %v189_v1  ;;  %161 = vset.pattern.permute.xlu0 %v189_v1  ;;  %v26_v2 = vld [vmem:[%s242_s2 + $0x10] sm:$0xff]  ;;  %v24_v3 = vld [vmem:[%s242_s2] sm:$0xff] }
   0x2   :  { %83 = vmatpush.bf16.msra.mxu0 %v143_v0  ;;  %155 = vmatpush.bf16.msra.mxu1 %v143_v0  ;;  %v142_v4 = vld [vmem:[%s240_s0] sm:$0xff] }
   0x3   :  { %8 = vsyncpa [#allocation3], 0  ;;  %40 = vperm.xlu1 %162, %v26_v2   ;;  %30 = vperm.xlu0 %161, %v24_v3   ;;  %v140_v5 = vld [vmem:[%s241_s1] sm:$0xff]  ;;  %v141_v6 = vld [vmem:[%s241_s1 + $0x8] sm:$0xff]  ;;  %vm70_vm0 = vcmask 261120   ;;  %s190_s1 = smov [#allocation2]  }
   0x4   :  { %v27_v7 = vld [vmem:[%s242_s2 + $0x18] sm:$0xff]  ;;  %v25_v8 = vld [vmem:[%s242_s2 + $0x8] sm:$0xff]  ;;  %s108_s27 = sshll.u32 %s190_s1, 4  ;;  %s110_s30 = sshll.u32 %s243_s3, 4  ;;  %s109_s27 = int_to_ptr.vmem [resolvable:$true] %s108_s27  ;;  %s111_s30 = int_to_ptr.hbm [resolvable:$true] %s110_s30 }
   0x5   :  { %s191_s2 = smov 64   ;;  %s192_s4 = smov 4  }
   0x6   :  { %84 = vmatpush.bf16.msra.mxu0 %v142_v4  ;;  %156 = vmatpush.bf16.msra.mxu1 %v142_v4 }
   0x9   :  { %138 = vmatmul.msk.bf16.vlgmr.msra.gmra.mxu0 %vm70_vm0, %v140_v5  ;;  %139 = vmatmul.msk.bf16.vlgmr.msra.gmra.mxu1 %vm70_vm0, %v141_v6 }
   0xb   :  { %45 = vperm.xlu1 %162, %v27_v7   ;;  %35 = vperm.xlu0 %161, %v25_v8  }
  0x75   :  { %v41_v9 = vpop.permute.xlu1 %40  ;;  %v31_v10 = vpop.permute.xlu0 %30 }
  0x7d   :  { %v46_v13 = vpop.permute.xlu1 %45  ;;  %v36_v14 = vpop.permute.xlu0 %35 }
  0x86   :  { %v86_v11 = vpop.f32.mrf.mxu0  ;;  %v91_v12 = vpop.f32.mrf.mxu1 }
  0x87   :  { %v87_v17 = vadd.f32 %v86_v11, %v31_v10  ;;  %v92_v18 = vadd.f32 %v91_v12, %v41_v9 }
  0x8e   :  { %v88_v15 = vpop.f32.mrf.mxu0  ;;  %v93_v16 = vpop.f32.mrf.mxu1 }
  0x8f   :  { %v89_v19 = vadd.f32 %v88_v15, %v36_v14  ;;  %v94_v20 = vadd.f32 %v93_v16, %v46_v13 }
  0x91   :  { %v147_v21 = vpack.c.bf16 %v89_v19, %v87_v17  ;;  %v152_v22 = vpack.c.bf16 %v94_v20, %v92_v18 }
  0x93   :  { %148 = vst [vmem:[#allocation2] sm:$0xff] %v147_v21  }
  0x94   :  { %154 = vst [vmem:[#allocation2 + $0x8] sm:$0xff] %v152_v22  }
  0x95   :  { %116 = dma.vmem_to_hbm [thread:$0]  %s109_s27, 256, %s111_s30, [#allocation3], %s191_s2, %s191_s2, %s192_s4  }
  0x96   :  { %187 = dma.done.wait [#allocation3], 256  }
  0x97   :  { %188 = vsyncadd [#allocation3], 4294967040 }
  0x98   :  { %121 = vsyncpa [#allocation3], 1 }

</bundles_post_ra>
